<compile_context>
chip_gen: v5e
topology: v5e:2x2
jax: 0.10.0
libtpu: 0.0.40
codegen_flags: <defaults>
</compile_context>

<pallas_src>
import functools

import jax
import jax.numpy as jnp
from jax import lax
from jax.experimental import pallas as pl
from jax.experimental.pallas import tpu as pltpu


# --------------------------------------------------------------------------
# VMEM budgeting (generation-aware)
# --------------------------------------------------------------------------
def _round_up(x, mult):
    return ((x + mult - 1) // mult) * mult


def _vmem_capacity_bytes():
    try:
        return int(pltpu.get_tpu_info().vmem_capacity_bytes)
    except Exception:
        return 64 << 20  # conservative fallback (v7x per-TensorCore)


def _vmem_budgets():
    """(per-feature-tile byte budget, total scoped VMEM cap) per generation."""
    cap = _vmem_capacity_bytes()
    if cap >= (100 << 20):            # v5e / v6e: 128 MiB physical VMEM
        return 16 << 20, 100 << 20
    return 10 << 20, 40 << 20         # v7x: 64 MiB per TC (scoped default 32)


def _choose_tk(k, m, itemsize, resident_bytes):
    """Lane-aligned K tile: as large as the per-generation VMEM budget allows.

    Keeps 2 * feature_tile + resident_bytes + headroom <= scoped cap.
    """
    tile_budget, scoped_cap = _vmem_budgets()
    headroom = 2 << 20
    by_total = max((scoped_cap - headroom - resident_bytes) // 2, 1 << 20)
    budget = min(tile_budget, by_total)
    tk_cap = max((budget // max(m * itemsize, 1)) // 128 * 128, 128)
    return min(_round_up(k, 128), tk_cap)


def _vmem_limit(actual_bytes):
    _, scoped_cap = _vmem_budgets()
    return int(min(max(actual_bytes + (2 << 20), 8 << 20), scoped_cap))


def _prep_features(x):
    """Flatten NCHW -> (M, K).  No padding, no extra HBM pass."""
    a, b, c, d = x.shape
    return x.reshape(a * b, c * d), a * b, c * d


def _maybe_mask(f, kk, tk, k_valid, needs_mask):
    """Zero lanes beyond the true K extent (ragged last tile).

    Cheap VPU select; only compiled in when k is not a multiple of tk.
    OOB lanes of an edge block are NOT guaranteed zero, so this is required
    for correctness of the Gram accumulation.
    """
    if not needs_mask:
        return f
    lane = lax.broadcasted_iota(jnp.int32, f.shape, 1)
    return jnp.where((kk * tk + lane) < k_valid, f, jnp.zeros_like(f))


# --------------------------------------------------------------------------
# kernels
# --------------------------------------------------------------------------
def _gram_kernel(feat_ref, g_ref, *, scale, k_valid, tk, needs_mask):
    """G = (F @ F^T) * scale, K-tiled; output block is resident across K."""
    kk = pl.program_id(0)

    @pl.when(kk == 0)
    def _():
        g_ref[...] = jnp.zeros_like(g_ref)

    f = _maybe_mask(feat_ref[...], kk, tk, k_valid, needs_mask)  # (M, tk)
    g_ref[...] += lax.dot_general(
        f, f,
        dimension_numbers=(((1,), (1,)), ((), ())),   # contract K with K
        preferred_element_type=jnp.float32,
    )

    @pl.when(kk == pl.num_programs(0) - 1)
    def _():
        g_ref[...] *= scale


def _gram_mse_kernel(feat_ref, target_ref, loss_ref, acc_ref,
                     *, scale, inv_mm, k_valid, tk, needs_mask):
    """Fused forward: K-tiled Gram accumulation + MSE vs. target Gram.

    Only the scalar loss is written back (SMEM); the Gram stays in VMEM.
    """
    kk = pl.program_id(0)

    @pl.when(kk == 0)
    def _():
        acc_ref[...] = jnp.zeros_like(acc_ref)

    f = _maybe_mask(feat_ref[...], kk, tk, k_valid, needs_mask)  # (M, tk)
    acc_ref[...] += lax.dot_general(
        f, f,
        dimension_numbers=(((1,), (1,)), ((), ())),
        preferred_element_type=jnp.float32,
    )

    @pl.when(kk == pl.num_programs(0) - 1)
    def _():
        diff = acc_ref[...] * scale - target_ref[...].astype(jnp.float32)
        loss_ref[0, 0] = jnp.sum(diff * diff) * inv_mm


# --------------------------------------------------------------------------
# wrappers
# --------------------------------------------------------------------------
def gram_matrix(x):
    """Pallas Gram matrix of an NCHW feature tensor: (a*b, a*b) f32."""
    feats, m, k = _prep_features(x)
    itemsize = jnp.dtype(feats.dtype).itemsize
    gram_bytes = m * m * 4
    resident = 2 * gram_bytes                       # double-buffered output
    tk = _choose_tk(k, m, itemsize, resident)
    nk = (k + tk - 1) // tk
    needs_mask = (k % tk) != 0

    kernel = functools.partial(
        _gram_kernel,
        scale=1.0 / float(m * k), k_valid=k, tk=tk, needs_mask=needs_mask,
    )
    feat_tile_bytes = m * tk * itemsize
    return pl.pallas_call(
        kernel,
        out_shape=jax.ShapeDtypeStruct((m, m), jnp.float32),
        grid_spec=pltpu.PrefetchScalarGridSpec(
            num_scalar_prefetch=0,
            grid=(nk,),
            in_specs=[pl.BlockSpec((m, tk), lambda kk: (0, kk))],
            out_specs=pl.BlockSpec((m, m), lambda kk: (0, 0)),
        ),
        compiler_params=pltpu.CompilerParams(
            dimension_semantics=("arbitrary",),
            vmem_limit_bytes=_vmem_limit(2 * feat_tile_bytes + resident),
        ),
    )(feats)


def style_forward(input_image, target_gram, cast_to_bf16=False):
    """Fused Gram + MSE kernel. Returns the scalar style loss."""
    feats, m, k = _prep_features(input_image)
    if cast_to_bf16:
        feats = feats.astype(jnp.bfloat16)   # halves HBM traffic; f32 accum
    itemsize = jnp.dtype(feats.dtype).itemsize
    t_itemsize = jnp.dtype(target_gram.dtype).itemsize
    resident = 2 * m * m * t_itemsize + m * m * 4   # 2x target buf + scratch
    tk = _choose_tk(k, m, itemsize, resident)
    nk = (k + tk - 1) // tk
    needs_mask = (k % tk) != 0

    kernel = functools.partial(
        _gram_mse_kernel,
        scale=1.0 / float(m * k),
        inv_mm=1.0 / float(m * m),
        k_valid=k, tk=tk, needs_mask=needs_mask,
    )
    feat_tile_bytes = m * tk * itemsize
    loss = pl.pallas_call(
        kernel,
        out_shape=jax.ShapeDtypeStruct((1, 1), jnp.float32),
        grid_spec=pltpu.PrefetchScalarGridSpec(
            num_scalar_prefetch=0,
            grid=(nk,),
            in_specs=[
                pl.BlockSpec((m, tk), lambda kk: (0, kk)),   # streamed F tiles
                pl.BlockSpec((m, m), lambda kk: (0, 0)),     # resident target G
            ],
            out_specs=pl.BlockSpec(memory_space=pltpu.MemorySpace.SMEM),
            scratch_shapes=[pltpu.VMEM((m, m), jnp.float32)],
        ),
        compiler_params=pltpu.CompilerParams(
            dimension_semantics=("arbitrary",),
            vmem_limit_bytes=_vmem_limit(2 * feat_tile_bytes + resident),
        ),
    )(feats, target_gram)
    return loss[0, 0]


class StyleLossPallas:
    """JAX/Pallas equivalent of the PyTorch StyleLoss module."""

    def __init__(self, target_feature):
        # "detach": target Gram is a constant, computed once at init.
        self.target = gram_matrix(target_feature)
        self.loss = None

    def __call__(self, input_image):
        self.loss = style_forward(input_image, self.target)
        # Module returns the input unchanged (pass-through for the style net).
        return input_image


# --------------------------------------------------------------------------
# self-test
# --------------------------------------------------------------------------
if __name__ == "__main__":
    def _ref_gram(x):
        a, b, c, d = x.shape
        f = x.reshape(a * b, c * d)
        return (f @ f.T) / (a * b * c * d)

    def _check(shape, key):
        k_tgt, k_in = jax.random.split(key)
        target_feature = jax.random.normal(k_tgt, shape, dtype=jnp.float32)
        input_image = jax.random.normal(k_in, shape, dtype=jnp.float32)

        module = StyleLossPallas(target_feature)
        out = module(input_image)
        jax.block_until_ready(out)
        jax.block_until_ready(module.loss)

        g_ref = _ref_gram(input_image)
        t_ref = _ref_gram(target_feature)
        loss_ref = jnp.mean((g_ref - t_ref) ** 2)

        assert jnp.allclose(out, input_image), "forward must pass input through"
        assert jnp.allclose(module.target, t_ref, rtol=1e-5, atol=1e-6)
        assert jnp.allclose(module.loss, loss_ref, rtol=1e-5, atol=1e-6)

    key = jax.random.PRNGKey(0)
    k0, k1 = jax.random.split(key)
    # Small NCHW shapes: batch=2, channels=4, spatial=16x16 (K = 256, aligned).
    _check((2, 4, 16, 16), k0)
    # Ragged K (c*d = 100, not a lane multiple) exercises the in-kernel mask.
    _check((2, 4, 10, 10), k1)

    print("KERNEL_OK")
</pallas_src>

<mosaic_0001>
module attributes {stable_mosaic.version = 11 : i64} {
  func.func @_gram_kernel(%arg0: i32, %arg1: memref<8x256xf32, #tpu.memory_space<vmem>>, %arg2: memref<8x8xf32, #tpu.memory_space<vmem>>) attributes {dimension_semantics = [#tpu.dimension_semantics<arbitrary>], iteration_bounds = array<i64: 1>, scalar_prefetch = 0 : i64, scratch_operands = 0 : i64, tpu.core_type = #tpu.core_type<tc>, window_params = [{transform_indices = @transform_0, window_bounds = array<i64: 8, 256>}, {pipeline_mode = #tpu.pipeline_mode<synchronous>, transform_indices = @transform_1, window_bounds = array<i64: 8, 8>}]} {
    %c0_i32 = arith.constant 0 : i32
    %0 = arith.cmpi eq, %arg0, %c0_i32 : i32
    %1 = arith.extui %0 : i1 to i32
    %c0_i32_0 = arith.constant 0 : i32
    %2 = arith.cmpi ne, %1, %c0_i32_0 : i32
    scf.if %2 {
      %cst_8 = arith.constant 0.000000e+00 : f32
      %11 = vector.broadcast %cst_8 : f32 to vector<8x8xf32>
      %c0_9 = arith.constant 0 : index
      %c0_10 = arith.constant 0 : index
      %12 = vector.load %arg2[%c0_9, %c0_10] : memref<8x8xf32, #tpu.memory_space<vmem>>, vector<8x8xf32>
      tpu.vector_store %arg2[%c0_9, %c0_10], %11 {strides = array<i32>} : memref<8x8xf32, #tpu.memory_space<vmem>>, vector<8x8xf32>,
    } else {
    }
    %c0 = arith.constant 0 : index
    %c0_1 = arith.constant 0 : index
    %3 = vector.load %arg1[%c0, %c0_1] : memref<8x256xf32, #tpu.memory_space<vmem>>, vector<8x256xf32>
    %c0_2 = arith.constant 0 : index
    %c0_3 = arith.constant 0 : index
    %4 = vector.load %arg2[%c0_2, %c0_3] : memref<8x8xf32, #tpu.memory_space<vmem>>, vector<8x8xf32>
    %cst = arith.constant dense<0.000000e+00> : vector<8x8xf32>
    %5 = tpu.matmul %3, %3, %cst {dimension_numbers = #tpu.dot_dimension_numbers<[1], [1], [0], [0], [0, 0, 1, 0], [], []>} : vector<8x256xf32>, vector<8x256xf32>, vector<8x8xf32> -> vector<8x8xf32>
    %6 = arith.addf %4, %5 : vector<8x8xf32>
    %c0_4 = arith.constant 0 : index
    %c0_5 = arith.constant 0 : index
    %7 = vector.load %arg2[%c0_4, %c0_5] : memref<8x8xf32, #tpu.memory_space<vmem>>, vector<8x8xf32>
    tpu.vector_store %arg2[%c0_4, %c0_5], %6 {strides = array<i32>} : memref<8x8xf32, #tpu.memory_space<vmem>>, vector<8x8xf32>,
    %c0_i32_6 = arith.constant 0 : i32
    %8 = arith.cmpi eq, %arg0, %c0_i32_6 : i32
    %9 = arith.extui %8 : i1 to i32
    %c0_i32_7 = arith.constant 0 : i32
    %10 = arith.cmpi ne, %9, %c0_i32_7 : i32
    scf.if %10 {
      %c0_8 = arith.constant 0 : index
      %c0_9 = arith.constant 0 : index
      %11 = vector.load %arg2[%c0_8, %c0_9] : memref<8x8xf32, #tpu.memory_space<vmem>>, vector<8x8xf32>
      %cst_10 = arith.constant 4.8828125E-4 : f32
      %12 = vector.broadcast %cst_10 : f32 to vector<8x8xf32>
      %13 = arith.mulf %11, %12 : vector<8x8xf32>
      %c0_11 = arith.constant 0 : index
      %c0_12 = arith.constant 0 : index
      %14 = vector.load %arg2[%c0_11, %c0_12] : memref<8x8xf32, #tpu.memory_space<vmem>>, vector<8x8xf32>
      tpu.vector_store %arg2[%c0_11, %c0_12], %13 {strides = array<i32>} : memref<8x8xf32, #tpu.memory_space<vmem>>, vector<8x8xf32>,
    } else {
    }
    return
  }
  func.func @transform_0(%arg0: i32) -> (i32, i32) {
    %c0_i32 = arith.constant 0 : i32
    %c0_i32_0 = arith.constant 0 : i32
    return %c0_i32, %arg0 : i32, i32
  }
  func.func @transform_1(%arg0: i32) -> (i32, i32) {
    %c0_i32 = arith.constant 0 : i32
    %c0_i32_0 = arith.constant 0 : i32
    %c0_i32_1 = arith.constant 0 : i32
    return %c0_i32, %c0_i32_0 : i32, i32
  }
}

</mosaic_0001>

<bundles_post_ra>
// kernel: tpu_custom_call.1
= control target key start
LH: loop header
LB: loop body
LE: loop exit
PB: predicated region body
PF: predicated region fallthrough
CT: control target
= control target key end

     0   :  { %6 = vsyncpa [#allocation3], 0  ;;  %s175_s0 = inlined_call_operand.hbm [shape: f32[8,256], index: 0, kind: input, shape index: {}]   ;;  %s176_s1 = inlined_call_operand.hbm [shape: f32[8,8], index: 1, kind: output, shape index: {}]  }
   0x1   :  { %7 = vsyncpa [#allocation4], 0  ;;  %s13_s8 = sshll.u32 %s175_s0, 4  ;;  %s153_s9 = smov [#allocation2]   ;;  %s14_s8 = int_to_ptr.hbm [resolvable:$true] %s13_s8 }
   0x2   :  { %s15_s10 = sshll.u32 %s153_s9, 4  ;;  %s16_s10 = int_to_ptr.vmem [resolvable:$true] %s15_s10 }
   0x3   :  { %18 = dma.hbm_to_vmem [thread:$0]  %s14_s8, 256, %s16_s10, [#allocation3]  }
   0x4   :  { %149 = dma.done.wait [#allocation3], 256  }
   0x5   :  { %150 = vsyncadd [#allocation3], 4294967040  ;;  %v29_v0 = vld [vmem:[#allocation2] sm:$0xff]  ;;  %v30_v1 = vld [vmem:[#allocation2 + $0x8] sm:$0xff]  ;;  %vm27_vm0 = vcmask 64512   ;;  %v154_v2 = vmov 0.0  }
   0x6   :  { %47 = vmatpush.xpose.msra.mxu0 %v29_v0  ;;  %67 = vmatpush.xpose.msra.mxu1 %v30_v1  ;;  %28 = vst.msk [vmem:[#allocation5] sm:$0xff] %vm27_vm0, %v154_v2  ;;  %s155_s0 = smov [#allocation5]   ;;  %s88_s14 = sshll.u32 %s176_s1, 4  ;;  %s89_s14 = int_to_ptr.hbm [resolvable:$true] %s88_s14 }
   0x7   :  { %s86_s11 = sshll.u32 %s155_s0, 4  ;;  %s87_s11 = int_to_ptr.vmem [resolvable:$true] %s86_s11 }
   0x9   :  { %48 = vmatmul.f32.vlgmr.msra.gmra.mxu0 %v29_v0  ;;  %68 = vmatmul.f32.vlgmr.msra.gmra.mxu1 %v30_v1 }
   0xd   :  { %v31_v4 = vld [vmem:[#allocation5] sm:$0xff] }
  0x86   :  { %v49_v3 = vpop.f32.mrf.mxu0  ;;  %v69_v5 = vpop.f32.mrf.mxu1 }
  0x87   :  { %v70_v6 = vadd.f32 %v69_v5, %v49_v3 }
  0x89   :  { %v72_v7 = vadd.f32 %v70_v6, %v31_v4 }
  0x8b   :  { %74 = vst.msk [vmem:[#allocation5] sm:$0xff] %vm27_vm0, %v72_v7 }
  0x92   :  { %v78_v8 = vld [vmem:[#allocation5] sm:$0xff] }
  0x93   :  { %v79_v9 = vmul.f32 0.00048828125, %v78_v8 }
  0x95   :  { %80 = vst.msk [vmem:[#allocation5] sm:$0xff] %vm27_vm0, %v79_v9 }
  0x96   :  { %91 = dma.vmem_to_hbm [thread:$0]  %s87_s11, 128, %s89_s14, [#allocation4]  }
  0x97   :  { %151 = dma.done.wait [#allocation4], 128  }
  0x98   :  { %152 = vsyncadd [#allocation4], 4294967168 }
  0x99   :  { %96 = vsyncpa [#allocation3], 1 }
  0x9a   :  { %97 = vsyncpa [#allocation4], 1 }

</bundles_post_ra>
